<compile_context>
chip_gen: v7x
topology: tpu7x:2x2x1
jax: 0.10.0
libtpu: 0.0.40
codegen_flags: <defaults>
</compile_context>

<pallas_src>
import jax
import jax.numpy as jnp
from jax.experimental import pallas as pl
from jax.experimental.pallas import tpu as pltpu


def _round_up(x, m):
    return ((x + m - 1) // m) * m


def _pad2(a, rows, cols):
    pr = rows - a.shape[0]
    pc = cols - a.shape[1]
    if pr == 0 and pc == 0:
        return a
    return jnp.pad(a, ((0, pr), (0, pc)))


def agent_policy_kernel(x_ref, w1_ref, b1_ref, w2_ref, b2_ref, w3_ref, b3_ref,
                        o_ref):
    # Cast after the DMA (x travels HBM->VMEM in its original f32 dtype; the
    # VPU cast hides under the DMA).  No-op when weights are f32.
    x = x_ref[...].astype(w1_ref.dtype)                        # (bm, d_in)

    # fc1 + ReLU (f32 accumulation, f32 bias)
    h1 = jnp.dot(x, w1_ref[...], preferred_element_type=jnp.float32)
    h1 = jnp.maximum(h1 + b1_ref[...], 0.0).astype(w2_ref.dtype)   # (bm, H_p)

    # fc2 + ReLU
    h2 = jnp.dot(h1, w2_ref[...], preferred_element_type=jnp.float32)
    h2 = jnp.maximum(h2 + b2_ref[...], 0.0).astype(w3_ref.dtype)   # (bm, H_p)

    # fc3 + bias.  Only column 0 is real; padded columns are exact zeros.
    z = jnp.dot(h2, w3_ref[...], preferred_element_type=jnp.float32)
    z = z + b3_ref[...]                                             # (bm, 128)

    # Pack the per-row scalars lane-dense: (bm,128) -> (bm//128,128,128),
    # transpose the last two dims (XLU vxpose), take sublane 0.  Sigmoid is
    # applied after extraction (bm EUP ops instead of bm*128).
    bm = z.shape[0]
    zt = jnp.swapaxes(z.reshape(bm // 128, 128, 128), -1, -2)      # (G,128,128)
    packed = zt[:, 0, :]                                           # (G, 128)
    o_ref[...] = jax.nn.sigmoid(packed).astype(o_ref.dtype)


def prepare_params(params, *, compute_dtype=jnp.float32):
    """One-time weight prep (hoisted out of the per-call path).

    Pads hidden/output feature dims to lane multiples (inert zero padding),
    keeps K of w1 at the true input size, and casts weights to the compute
    dtype (biases stay f32).  On v5e keep compute_dtype=f32.
    """
    d_in, H = params["w1"].shape
    H_p = _round_up(H, 128)
    N_PAD = 128                       # lane-dense fc3 output; column 0 is real
    return dict(
        w1=_pad2(params["w1"], d_in, H_p).astype(compute_dtype),
        b1=_pad2(params["b1"], 1, H_p).astype(jnp.float32),
        w2=_pad2(params["w2"], H_p, H_p).astype(compute_dtype),
        b2=_pad2(params["b2"], 1, H_p).astype(jnp.float32),
        w3=_pad2(params["w3"], H_p, N_PAD).astype(compute_dtype),
        b3=_pad2(params["b3"], 1, N_PAD).astype(jnp.float32),
    )


def _choose_tile(B, max_bm):
    """Pick (bm, padded_B).

    Single-step grids use bm = round_up(B, 128) (block == full array, so any
    multiple of 128 is legal).  Multi-step grids need the packed-output block's
    sublane dim (bm // 128) to be a multiple of 8, i.e. bm a multiple of 1024;
    they also use at least 2 steps so v7x's two TensorCores both get work.
    """
    bm_single = _round_up(B, 128)
    if bm_single <= min(max_bm, 1024):
        return bm_single, bm_single
    max_bm = max(1024, (max_bm // 1024) * 1024)
    bm = min(max_bm, _round_up(pl.cdiv(B, 2), 1024))
    return bm, _round_up(B, bm)


def agent_policy_forward(x, prepared, *, max_bm=4096):
    """x: (B, input_size) float32.  `prepared` comes from prepare_params()."""
    B, d_in = x.shape
    w1 = prepared["w1"]
    assert w1.shape[0] == d_in, "prepared params do not match x's feature size"
    H_p = w1.shape[1]
    N_PAD = prepared["w3"].shape[1]

    bm, B_p = _choose_tile(B, max_bm)
    x_p = x if B_p == B else jnp.pad(x, ((0, B_p - B), (0, 0)))
    grid = (B_p // bm,)

    weights = (prepared["w1"], prepared["b1"], prepared["w2"], prepared["b2"],
               prepared["w3"], prepared["b3"])
    bytes_accessed = int(x_p.size * x_p.dtype.itemsize
                         + sum(int(a.size) * a.dtype.itemsize for a in weights)
                         + (B_p // 128) * 128 * 4)
    flops = int(2 * B_p * (d_in * H_p + H_p * H_p + H_p * N_PAD))
    cost = pl.CostEstimate(flops=flops, transcendentals=int(B_p),
                           bytes_accessed=bytes_accessed)

    out = pl.pallas_call(
        agent_policy_kernel,
        out_shape=jax.ShapeDtypeStruct((B_p // 128, 128), jnp.float32),
        grid_spec=pltpu.PrefetchScalarGridSpec(
            num_scalar_prefetch=0,
            grid=grid,
            in_specs=[
                pl.BlockSpec((bm, d_in), lambda i: (i, 0)),      # x tile (unpadded lanes)
                pl.BlockSpec((d_in, H_p), lambda i: (0, 0)),     # w1 (resident)
                pl.BlockSpec((1, H_p), lambda i: (0, 0)),        # b1
                pl.BlockSpec((H_p, H_p), lambda i: (0, 0)),      # w2
                pl.BlockSpec((1, H_p), lambda i: (0, 0)),        # b2
                pl.BlockSpec((H_p, N_PAD), lambda i: (0, 0)),    # w3
                pl.BlockSpec((1, N_PAD), lambda i: (0, 0)),      # b3
            ],
            out_specs=pl.BlockSpec((bm // 128, 128), lambda i: (i, 0)),
        ),
        compiler_params=pltpu.CompilerParams(
            dimension_semantics=("parallel",)),
        cost_estimate=cost,
    )(x_p, *weights)

    # Packed (B_p//128, 128) scalars -> (B, 1); only B_p*4 bytes touched.
    return out.reshape(B_p, 1)[:B]


def init_params(key, input_size, hidden_size):
    """Matches PyTorch nn.Linear default init: U(-k, k), k = 1/sqrt(fan_in)."""
    ks = jax.random.split(key, 6)

    def lin(kw, kb, fan_in, fan_out):
        bound = 1.0 / jnp.sqrt(float(fan_in))
        w = jax.random.uniform(kw, (fan_in, fan_out), jnp.float32, -bound, bound)
        b = jax.random.uniform(kb, (1, fan_out), jnp.float32, -bound, bound)
        return w, b

    w1, b1 = lin(ks[0], ks[1], input_size, hidden_size)
    w2, b2 = lin(ks[2], ks[3], hidden_size, hidden_size)
    w3, b3 = lin(ks[4], ks[5], hidden_size, 1)
    return dict(w1=w1, b1=b1, w2=w2, b2=b2, w3=w3, b3=b3)


def reference_forward(x, p):
    h1 = jnp.maximum(x @ p["w1"] + p["b1"], 0.0)
    h2 = jnp.maximum(h1 @ p["w2"] + p["b2"], 0.0)
    return jax.nn.sigmoid(h2 @ p["w3"] + p["b3"])


if __name__ == "__main__":
    INPUT_SIZE = 32
    HIDDEN_SIZE = 64
    BATCH = 50          # deliberately not 128-aligned: exercises row padding

    key = jax.random.PRNGKey(0)
    k_x, k_p, k_x2 = jax.random.split(key, 3)
    x = jax.random.normal(k_x, (BATCH, INPUT_SIZE), dtype=jnp.float32)
    params = init_params(k_p, INPUT_SIZE, HIDDEN_SIZE)

    ref = jax.block_until_ready(reference_forward(x, params))

    # f32 path: whole (padded-to-128) batch in a single grid step.
    prepared_f32 = prepare_params(params)                      # hoisted, once
    out = jax.block_until_ready(agent_policy_forward(x, prepared_f32))
    assert out.shape == (BATCH, 1)
    assert jnp.allclose(out, ref, atol=1e-5, rtol=1e-5), "f32 mismatch vs reference"

    # bf16 weights (v6e/v7x MXU), f32 x cast in-kernel, f32 accumulation.
    prepared_bf16 = prepare_params(params, compute_dtype=jnp.bfloat16)
    out_bf16 = jax.block_until_ready(agent_policy_forward(x, prepared_bf16))
    assert jnp.allclose(out_bf16, ref, atol=3e-2, rtol=3e-2), "bf16 mismatch"

    # Multi-step grid path (bm=1024, 2 steps -> both v7x cores) + row padding.
    x_big = jax.random.normal(k_x2, (1500, INPUT_SIZE), dtype=jnp.float32)
    ref_big = jax.block_until_ready(reference_forward(x_big, params))
    out_big = jax.block_until_ready(agent_policy_forward(x_big, prepared_f32))
    assert out_big.shape == (1500, 1)
    assert jnp.allclose(out_big, ref_big, atol=1e-5, rtol=1e-5), "tiled mismatch"

    print("KERNEL_OK")
</pallas_src>

<mosaic_0001>
module attributes {stable_mosaic.version = 11 : i64} {
  func.func @agent_policy_kernel(%arg0: i32, %arg1: memref<128x32xf32, #tpu.memory_space<vmem>>, %arg2: memref<32x128xf32, #tpu.memory_space<vmem>>, %arg3: memref<1x128xf32, #tpu.memory_space<vmem>>, %arg4: memref<128x128xf32, #tpu.memory_space<vmem>>, %arg5: memref<1x128xf32, #tpu.memory_space<vmem>>, %arg6: memref<128x128xf32, #tpu.memory_space<vmem>>, %arg7: memref<1x128xf32, #tpu.memory_space<vmem>>, %arg8: memref<1x128xf32, #tpu.memory_space<vmem>>) attributes {dimension_semantics = [#tpu.dimension_semantics<parallel>], iteration_bounds = array<i64: 1>, scalar_prefetch = 0 : i64, scratch_operands = 0 : i64, tpu.core_type = #tpu.core_type<tc>, window_params = [{transform_indices = @transform_0, window_bounds = array<i64: 128, 32>}, {pipeline_mode = #tpu.pipeline_mode<synchronous>, transform_indices = @transform_1, window_bounds = array<i64: 32, 128>}, {pipeline_mode = #tpu.pipeline_mode<synchronous>, transform_indices = @transform_2, window_bounds = array<i64: 1, 128>}, {pipeline_mode = #tpu.pipeline_mode<synchronous>, transform_indices = @transform_3, window_bounds = array<i64: 128, 128>}, {pipeline_mode = #tpu.pipeline_mode<synchronous>, transform_indices = @transform_4, window_bounds = array<i64: 1, 128>}, {pipeline_mode = #tpu.pipeline_mode<synchronous>, transform_indices = @transform_5, window_bounds = array<i64: 128, 128>}, {pipeline_mode = #tpu.pipeline_mode<synchronous>, transform_indices = @transform_6, window_bounds = array<i64: 1, 128>}, {transform_indices = @transform_7, window_bounds = array<i64: 1, 128>}]} {
    %c0 = arith.constant 0 : index
    %c0_0 = arith.constant 0 : index
    %0 = vector.load %arg1[%c0, %c0_0] : memref<128x32xf32, #tpu.memory_space<vmem>>, vector<128x32xf32>
    %c0_1 = arith.constant 0 : index
    %c0_2 = arith.constant 0 : index
    %1 = vector.load %arg2[%c0_1, %c0_2] : memref<32x128xf32, #tpu.memory_space<vmem>>, vector<32x128xf32>
    %cst = arith.constant dense<0.000000e+00> : vector<128x128xf32>
    %2 = tpu.matmul %0, %1, %cst {dimension_numbers = #tpu.dot_dimension_numbers<[1], [0], [0], [1], [0, 0, 1, 1], [], []>} : vector<128x32xf32>, vector<32x128xf32>, vector<128x128xf32> -> vector<128x128xf32>
    %c0_3 = arith.constant 0 : index
    %c0_4 = arith.constant 0 : index
    %3 = vector.load %arg3[%c0_3, %c0_4] : memref<1x128xf32, #tpu.memory_space<vmem>>, vector<1x128xf32>
    %4 = vector.broadcast %3 : vector<1x128xf32> to vector<128x128xf32>
    %5 = arith.addf %2, %4 : vector<128x128xf32>
    %cst_5 = arith.constant 0.000000e+00 : f32
    %6 = vector.broadcast %cst_5 : f32 to vector<128x128xf32>
    %7 = arith.maximumf %5, %6 : vector<128x128xf32>
    %c0_6 = arith.constant 0 : index
    %c0_7 = arith.constant 0 : index
    %8 = vector.load %arg4[%c0_6, %c0_7] : memref<128x128xf32, #tpu.memory_space<vmem>>, vector<128x128xf32>
    %cst_8 = arith.constant dense<0.000000e+00> : vector<128x128xf32>
    %9 = tpu.matmul %7, %8, %cst_8 {dimension_numbers = #tpu.dot_dimension_numbers<[1], [0], [0], [1], [0, 0, 1, 1], [], []>} : vector<128x128xf32>, vector<128x128xf32>, vector<128x128xf32> -> vector<128x128xf32>
    %c0_9 = arith.constant 0 : index
    %c0_10 = arith.constant 0 : index
    %10 = vector.load %arg5[%c0_9, %c0_10] : memref<1x128xf32, #tpu.memory_space<vmem>>, vector<1x128xf32>
    %11 = vector.broadcast %10 : vector<1x128xf32> to vector<128x128xf32>
    %12 = arith.addf %9, %11 : vector<128x128xf32>
    %cst_11 = arith.constant 0.000000e+00 : f32
    %13 = vector.broadcast %cst_11 : f32 to vector<128x128xf32>
    %14 = arith.maximumf %12, %13 : vector<128x128xf32>
    %c0_12 = arith.constant 0 : index
    %c0_13 = arith.constant 0 : index
    %15 = vector.load %arg6[%c0_12, %c0_13] : memref<128x128xf32, #tpu.memory_space<vmem>>, vector<128x128xf32>
    %cst_14 = arith.constant dense<0.000000e+00> : vector<128x128xf32>
    %16 = tpu.matmul %14, %15, %cst_14 {dimension_numbers = #tpu.dot_dimension_numbers<[1], [0], [0], [1], [0, 0, 1, 1], [], []>} : vector<128x128xf32>, vector<128x128xf32>, vector<128x128xf32> -> vector<128x128xf32>
    %c0_15 = arith.constant 0 : index
    %c0_16 = arith.constant 0 : index
    %17 = vector.load %arg7[%c0_15, %c0_16] : memref<1x128xf32, #tpu.memory_space<vmem>>, vector<1x128xf32>
    %18 = vector.broadcast %17 : vector<1x128xf32> to vector<128x128xf32>
    %19 = arith.addf %16, %18 : vector<128x128xf32>
    %20 = vector.shape_cast %19 : vector<128x128xf32> to vector<1x128x128xf32>
    %21 = tpu.transpose %20, [0, 2, 1] : vector<1x128x128xf32> -> vector<1x128x128xf32>
    %22 = vector.extract_strided_slice %21 {offsets = [0, 0, 0], sizes = [1, 1, 128], strides = [1, 1, 1]} : vector<1x128x128xf32> to vector<1x1x128xf32>
    %23 = vector.shape_cast %22 : vector<1x1x128xf32> to vector<1x128xf32>
    %24 = arith.negf %23 : vector<1x128xf32>
    %25 = math.exp %24 : vector<1x128xf32>
    %cst_17 = arith.constant 1.000000e+00 : f32
    %26 = vector.broadcast %cst_17 : f32 to vector<1x128xf32>
    %27 = arith.addf %26, %25 : vector<1x128xf32>
    %28 = arith.divf %26, %27 : vector<1x128xf32>
    %c0_18 = arith.constant 0 : index
    %c0_19 = arith.constant 0 : index
    %29 = vector.load %arg8[%c0_18, %c0_19] : memref<1x128xf32, #tpu.memory_space<vmem>>, vector<1x128xf32>
    tpu.vector_store %arg8[%c0_18, %c0_19], %28 {strides = array<i32>} : memref<1x128xf32, #tpu.memory_space<vmem>>, vector<1x128xf32>,
    return
  }
  func.func @transform_0(%arg0: i32) -> (i32, i32) {
    %c0_i32 = arith.constant 0 : i32
    %c0_i32_0 = arith.constant 0 : i32
    return %arg0, %c0_i32 : i32, i32
  }
  func.func @transform_1(%arg0: i32) -> (i32, i32) {
    %c0_i32 = arith.constant 0 : i32
    %c0_i32_0 = arith.constant 0 : i32
    %c0_i32_1 = arith.constant 0 : i32
    return %c0_i32, %c0_i32_0 : i32, i32
  }
  func.func @transform_2(%arg0: i32) -> (i32, i32) {
    %c0_i32 = arith.constant 0 : i32
    %c0_i32_0 = arith.constant 0 : i32
    %c0_i32_1 = arith.constant 0 : i32
    return %c0_i32, %c0_i32_0 : i32, i32
  }
  func.func @transform_3(%arg0: i32) -> (i32, i32) {
    %c0_i32 = arith.constant 0 : i32
    %c0_i32_0 = arith.constant 0 : i32
    %c0_i32_1 = arith.constant 0 : i32
    return %c0_i32, %c0_i32_0 : i32, i32
  }
  func.func @transform_4(%arg0: i32) -> (i32, i32) {
    %c0_i32 = arith.constant 0 : i32
    %c0_i32_0 = arith.constant 0 : i32
    %c0_i32_1 = arith.constant 0 : i32
    return %c0_i32, %c0_i32_0 : i32, i32
  }
  func.func @transform_5(%arg0: i32) -> (i32, i32) {
    %c0_i32 = arith.constant 0 : i32
    %c0_i32_0 = arith.constant 0 : i32
    %c0_i32_1 = arith.constant 0 : i32
    return %c0_i32, %c0_i32_0 : i32, i32
  }
  func.func @transform_6(%arg0: i32) -> (i32, i32) {
    %c0_i32 = arith.constant 0 : i32
    %c0_i32_0 = arith.constant 0 : i32
    %c0_i32_1 = arith.constant 0 : i32
    return %c0_i32, %c0_i32_0 : i32, i32
  }
  func.func @transform_7(%arg0: i32) -> (i32, i32) {
    %c0_i32 = arith.constant 0 : i32
    %c0_i32_0 = arith.constant 0 : i32
    return %arg0, %c0_i32 : i32, i32
  }
}

</mosaic_0001>

<bundles_post_ra>
// kernel: tpu_custom_call.1
= control target key start
LH: loop header
LB: loop body
LE: loop exit
PB: predicated region body
PF: predicated region fallthrough
CT: control target
= control target key end

     0   :  { %12 = vsyncpa [#allocation3], 0  ;;  %s1319_s0 = inlined_call_operand.vmem [shape: f32[128,32], index: 0, kind: input, shape index: {}]   ;;  %s1320_s1 = inlined_call_operand.vmem [shape: f32[32,128], index: 1, kind: input, shape index: {}]   ;;  %s1321_s2 = inlined_call_operand.vmem [shape: f32[1,128], index: 2, kind: input, shape index: {}]   ;;  %s1322_s3 = inlined_call_operand.vmem [shape: f32[128,128], index: 3, kind: input, shape index: {}]   ;;  %s1323_s4 = inlined_call_operand.vmem [shape: f32[1,128], index: 4, kind: input, shape index: {}]   ;;  %s1324_s5 = inlined_call_operand.hbm [shape: f32[128,128], index: 5, kind: input, shape index: {}]   ;;  %s1325_s6 = inlined_call_operand.vmem [shape: f32[1,128], index: 6, kind: input, shape index: {}]   ;;  %s1326_s7 = inlined_call_operand.hbm [shape: f32[1,128], index: 7, kind: output, shape index: {}]  }
   0x1   :  { %13 = vsyncpa [#allocation4], 0  ;;  %s1076_s24 = smov [#allocation2]   ;;  %s1028_s28 = scalar_lea.hbm %s1324_s5, 2048 }
   0x2   :  { %s29_s25 = sshll.u32 %s1076_s24, 4  ;;  %p1029_p0 = scmp.ne.s32.totalorder %s1324_s5, %s1028_s28  ;;  %s30_s25 = int_to_ptr.vmem [resolvable:$true] %s29_s25 }
   0x3   :  { %p1032_p1 = scmp.lt.u32.totalorder %s1028_s28, %s1324_s5 }
   0x5   :  { %p1034_p2 = pnand %p1032_p1, %p1029_p0 }
   0x7   :  { %1037 = shalt.err (!%p1034_p2)
}
   0x8   :  { %s1038_s10 = scalar_lea.vmem %s30_s25, 2048  ;;  %p1043_p4 = scmp.lt.s32.totalorder %s30_s25, %s30_s25 }
   0x9   :  { %p1039_p3 = scmp.ne.s32.totalorder %s30_s25, %s1038_s10  ;;  %p1044_p5 = scmp.lt.s32.totalorder %s1038_s10, %s1038_s10 }
   0xb   :  { %p1045_p6 = por %p1044_p5, %p1043_p4 }
   0xd   :  { %p1046_p7 = pnand %p1045_p6, %p1039_p3 }
   0xf   :  { %1049 = shalt.err (!%p1046_p7)
}
  0x10   :  { %s1077_s11 = smov 128   ;;  %s1078_s12 = smov 8  }
  0x11   :  { %35 = dma.hbm_to_vmem [thread:$0]  %s1324_s5, 2048, %s30_s25, [#allocation3], %s1077_s11, %s1077_s11, %s1078_s12  }
  0x12   :  { %1072 = dma.done.wait [#allocation3], 2048  }
  0x13   :  { %1073 = vsyncadd [#allocation3], 4294965248  ;;  %vm68_vm0 = vcmask 261120   ;;  %v57_v0 = vld [vmem:[%s1320_s1] sm:$0xff]  ;;  %v58_v1 = vld [vmem:[%s1320_s1 + $0x8] sm:$0xff] }
  0x14   :  { %v59_v2 = vld [vmem:[%s1320_s1 + $0x10] sm:$0xff]  ;;  %v932_v3 = vpack.c.bf16 %v58_v1, %v57_v0  ;;  %v60_v4 = vld [vmem:[%s1320_s1 + $0x18] sm:$0xff]  ;;  %v41_v5 = vld [vmem:[%s1319_s0] sm:$0xff] }
  0x15   :  { %v936_v6 = vpack.c.bf16 %v60_v4, %v59_v2  ;;  %796 = vmatprep.mubr.msk.f32.mxu0 %vm68_vm0, %v41_v5  ;;  %v278_v7 = vld [vmem:[%s1322_s3] sm:$0xff]  ;;  %v279_v8 = vld [vmem:[%s1322_s3 + $0x8] sm:$0xff]  ;;  %v280_v9 = vld [vmem:[%s1322_s3 + $0x10] sm:$0xff] }
  0x16   :  { %933 = vmatprep.subr.bf16.mxu0 %v932_v3  ;;  %v281_v10 = vld [vmem:[%s1322_s3 + $0x18] sm:$0xff]  ;;  %v42_v11 = vld [vmem:[%s1319_s0 + $0x8] sm:$0xff]  ;;  %v940_v12 = vpack.c.bf16 %v279_v8, %v278_v7  ;;  %v43_v14 = vld [vmem:[%s1319_s0 + $0x10] sm:$0xff] }
  0x17   :  { %935 = vmatpush3.bf16.msra.mxu0 %v932_v3  ;;  %v944_v13 = vpack.c.bf16 %v281_v10, %v280_v9  ;;  %v282_v15 = vld [vmem:[%s1322_s3 + $0x20] sm:$0xff]  ;;  %v283_v16 = vld [vmem:[%s1322_s3 + $0x28] sm:$0xff]  ;;  %v44_v17 = vld [vmem:[%s1319_s0 + $0x18] sm:$0xff] }
  0x18   :  { %937 = vmatprep.subr.bf16.mxu0 %v936_v6  ;;  %941 = vmatprep.subr.bf16.mxu1 %v940_v12  ;;  %v948_v18 = vpack.c.bf16 %v283_v16, %v282_v15  ;;  %v45_v19 = vld [vmem:[%s1319_s0 + $0x20] sm:$0xff]  ;;  %v284_v20 = vld [vmem:[%s1322_s3 + $0x30] sm:$0xff]  ;;  %v285_v21 = vld [vmem:[%s1322_s3 + $0x38] sm:$0xff] }
  0x19   :  { %943 = vmatpush3.bf16.msra.mxu1 %v940_v12  ;;  %v46_v22 = vld [vmem:[%s1319_s0 + $0x28] sm:$0xff]  ;;  %v952_v23 = vpack.c.bf16 %v285_v21, %v284_v20  ;;  %v47_v24 = vld [vmem:[%s1319_s0 + $0x30] sm:$0xff]  ;;  %v286_v25 = vld [vmem:[%s1322_s3 + $0x40] sm:$0xff] }
  0x1a   :  { %945 = vmatprep.subr.bf16.mxu1 %v944_v13  ;;  %v287_v26 = vld [vmem:[%s1322_s3 + $0x48] sm:$0xff]  ;;  %v48_v27 = vld [vmem:[%s1319_s0 + $0x38] sm:$0xff]  ;;  %v49_v29 = vld [vmem:[%s1319_s0 + $0x40] sm:$0xff] }
  0x1b   :  { %939 = vmatpush3.bf16.msra.mxu0 %v936_v6  ;;  %v956_v28 = vpack.c.bf16 %v287_v26, %v286_v25  ;;  %v288_v30 = vld [vmem:[%s1322_s3 + $0x50] sm:$0xff]  ;;  %v289_v31 = vld [vmem:[%s1322_s3 + $0x58] sm:$0xff]  ;;  %v50_v32 = vld [vmem:[%s1319_s0 + $0x48] sm:$0xff] }
  0x1c   :  { %v960_v33 = vpack.c.bf16 %v289_v31, %v288_v30  ;;  %v51_v34 = vld [vmem:[%s1319_s0 + $0x50] sm:$0xff]  ;;  %v290_v35 = vld [vmem:[%s1322_s3 + $0x60] sm:$0xff]  ;;  %v291_v36 = vld [vmem:[%s1322_s3 + $0x68] sm:$0xff] }
  0x1d   :  { %947 = vmatpush3.bf16.msra.mxu1 %v944_v13  ;;  %v52_v37 = vld [vmem:[%s1319_s0 + $0x58] sm:$0xff]  ;;  %v964_v38 = vpack.c.bf16 %v291_v36, %v290_v35  ;;  %v53_v39 = vld [vmem:[%s1319_s0 + $0x60] sm:$0xff]  ;;  %v54_v40 = vld [vmem:[%s1319_s0 + $0x68] sm:$0xff] }
  0x1e   :  { %797 = vmatmul.mubr.msk.f32.vlgmr.msra.gmra.mrb[0].mxu0 %vm68_vm0, %v42_v11  ;;  %949 = vmatprep.subr.bf16.mxu1 %v948_v18  ;;  %v55_v41 = vld [vmem:[%s1319_s0 + $0x70] sm:$0xff]  ;;  %v56_v42 = vld [vmem:[%s1319_s0 + $0x78] sm:$0xff]  ;;  %v462_v46 = vld [vmem:[#allocation2] sm:$0xff] }
  0x1f   :  { %799 = vmatprep.mubr.msk.f32.mxu0 %vm68_vm0, %v43_v14  ;;  %v292_v43 = vld [vmem:[%s1322_s3 + $0x70] sm:$0xff]  ;;  %v293_v44 = vld [vmem:[%s1322_s3 + $0x78] sm:$0xff]  ;;  %v463_v47 = vld [vmem:[#allocation2 + $0x8] sm:$0xff] }
  0x20   :  { %v968_v45 = vpack.c.bf16 %v293_v44, %v292_v43  ;;  %v464_v48 = vld [vmem:[#allocation2 + $0x10] sm:$0xff]  ;;  %v972_v49 = vpack.c.bf16 %v463_v47, %v462_v46  ;;  %v465_v50 = vld [vmem:[#allocation2 + $0x18] sm:$0xff]  ;;  %v466_v52 = vld [vmem:[#allocation2 + $0x20] sm:$0xff] }
  0x21   :  { %951 = vmatpush3.bf16.msra.mxu1 %v948_v18  ;;  %v976_v51 = vpack.c.bf16 %v465_v50, %v464_v48  ;;  %v467_v53 = vld [vmem:[#allocation2 + $0x28] sm:$0xff]  ;;  %v468_v55 = vld [vmem:[#allocation2 + $0x30] sm:$0xff]  ;;  %v469_v56 = vld [vmem:[#allocation2 + $0x38] sm:$0xff] }
  0x22   :  { %800 = vmatmul.mubr.msk.f32.gmra.mrb[2].mxu0 %vm68_vm0, %v44_v17  ;;  %953 = vmatprep.subr.bf16.mxu1 %v952_v23  ;;  %v980_v54 = vpack.c.bf16 %v467_v53, %v466_v52  ;;  %v1256_v57 = vpack.c.bf16 %v469_v56, %v468_v55  ;;  %v470_v58 = vld [vmem:[#allocation2 + $0x40] sm:$0xff]  ;;  %v471_v59 = vld [vmem:[#allocation2 + $0x48] sm:$0xff]  ;;  %v472_v61 = vld [vmem:[#allocation2 + $0x50] sm:$0xff] }
  0x23   :  { %802 = vmatprep.mubr.msk.f32.mxu0 %vm68_vm0, %v45_v19  ;;  %973 = vmatprep.subr.bf16.mxu0 %v972_v49  ;;  %v1259_v60 = vpack.c.bf16 %v471_v59, %v470_v58  ;;  %v473_v62 = vld [vmem:[#allocation2 + $0x58] sm:$0xff]  ;;  %v474_v0 = vld [vmem:[#allocation2 + $0x60] sm:$0xff]  ;;  %v475_v1 = vld [vmem:[#allocation2 + $0x68] sm:$0xff] }
  0x24   :  { %975 = vmatpush3.bf16.msra.mxu0 %v972_v49  ;;  %v1263_v63 = vpack.c.bf16 %v473_v62, %v472_v61  ;;  %v1267_v2 = vpack.c.bf16 %v475_v1, %v474_v0  ;;  %v1275_v3 = vld [vmem:[%s1321_s2] ss:$0 sm:$0xff]  ;;  %v476_v52 = vld [vmem:[#allocation2 + $0x70] sm:$0xff]  ;;  %v477_v53 = vld [vmem:[#allocation2 + $0x78] sm:$0xff] }
  0x25   :  { %955 = vmatpush3.bf16.msra.mxu1 %v952_v23  ;;  %977 = vmatprep.subr.bf16.mxu0 %v976_v51  ;;  %v701_v55 = vld [vmem:[%s1323_s4] ss:$0 sm:$0xff] }
  0x26   :  { %803 = vmatmul.mubr.msk.f32.gmra.mrb[4].mxu0 %vm68_vm0, %v46_v22  ;;  %957 = vmatprep.subr.bf16.mxu1 %v956_v28 }
  0x27   :  { %805 = vmatprep.mubr.msk.f32.mxu0 %vm68_vm0, %v47_v24 }
  0x28   :  { %979 = vmatpush3.bf16.msra.mxu0 %v976_v51 }
  0x29   :  { %959 = vmatpush3.bf16.msra.mxu1 %v956_v28  ;;  %981 = vmatprep.subr.bf16.mxu0 %v980_v54 }
  0x2a   :  { %806 = vmatmul.mubr.msk.f32.gmra.mrb[6].mxu0 %vm68_vm0, %v48_v27  ;;  %961 = vmatprep.subr.bf16.mxu1 %v960_v33 }
  0x2b   :  { %808 = vmatprep.mubr.msk.f32.mxu0 %vm68_vm0, %v49_v29 }
  0x2c   :  { %983 = vmatpush3.bf16.msra.mxu0 %v980_v54 }
  0x2d   :  { %963 = vmatpush3.bf16.msra.mxu1 %v960_v33  ;;  %985 = vmatprep.subr.bf16.mxu0 %v1256_v57 }
  0x2e   :  { %809 = vmatmul.mubr.msk.f32.gmra.mrb[8].mxu0 %vm68_vm0, %v50_v32  ;;  %965 = vmatprep.subr.bf16.mxu1 %v964_v38 }
  0x2f   :  { %811 = vmatprep.mubr.msk.f32.mxu0 %vm68_vm0, %v51_v34 }
  0x30   :  { %987 = vmatpush3.bf16.msra.mxu0 %v1256_v57 }
  0x31   :  { %967 = vmatpush3.bf16.msra.mxu1 %v964_v38  ;;  %989 = vmatprep.subr.bf16.mxu0 %v1259_v60 }
  0x32   :  { %812 = vmatmul.mubr.msk.f32.gmra.mrb[10].mxu0 %vm68_vm0, %v52_v37  ;;  %969 = vmatprep.subr.bf16.mxu1 %v968_v45 }
  0x33   :  { %814 = vmatprep.mubr.msk.f32.mxu0 %vm68_vm0, %v53_v39 }
  0x34   :  { %991 = vmatpush3.bf16.msra.mxu0 %v1259_v60 }
  0x35   :  { %971 = vmatpush3.bf16.msra.mxu1 %v968_v45  ;;  %993 = vmatprep.subr.bf16.mxu0 %v1263_v63 }
  0x36   :  { %815 = vmatmul.mubr.msk.f32.gmra.mrb[12].mxu0 %vm68_vm0, %v54_v40  ;;  %1004 = vmatprep.subr.bf16.mxu1 %v972_v49 }
  0x37   :  { %817 = vmatprep.mubr.msk.f32.mxu0 %vm68_vm0, %v55_v41 }
  0x38   :  { %995 = vmatpush3.bf16.msra.mxu0 %v1263_v63 }
  0x39   :  { %997 = vmatprep.subr.bf16.mxu0 %v1267_v2 }
  0x3a   :  { %818 = vmatmul.mubr.msk.f32.gmra.mrb[14].mxu0 %vm68_vm0, %v56_v42 }
  0x3c   :  { %999 = vmatpush3.bf16.msra.mxu0 %v1267_v2 }
  0xf1   :  { %v798_v4 = vpop.f32.mrb[0].mxu0 }
  0xf2   :  { %v189_v5 = vadd.f32 %v798_v4, %v1275_v3  ;;  %v183_v6 = vpop.f32.mrb[1].mxu0 }
  0xf3   :  { %v184_v7 = vadd.f32 %v1275_v3, %v183_v6 }
  0xf4   :  { %v263_v10 = vmax.f32 %v189_v5, 0.0 }
  0xf5   :  { %v801_v8 = vpop.f32.mrb[2].mxu0  ;;  %v262_v9 = vmax.f32 %v184_v7, 0.0 }
  0xf6   :  { %v199_v11 = vadd.f32 %v801_v8, %v1275_v3  ;;  %v193_v12 = vpop.f32.mrb[3].mxu0 }
  0xf7   :  { %v194_v13 = vadd.f32 %v1275_v3, %v193_v12  ;;  %852 = vmatprep.mubr.f32.mxu1 %v262_v9 }
  0xf8   :  { %v265_v14 = vmax.f32 %v199_v11, 0.0  ;;  %853 = vmatmul.mubr.f32.vlgmr.msra.gmra.mrb[0].mxu1 %v263_v10 }
  0xf9   :  { %v264_v15 = vmax.f32 %v194_v13, 0.0  ;;  %v804_v16 = vpop.f32.mrb[4].mxu0  ;;  %1012 = vmatpush3.bf16.msra.mxu1 %v972_v49 }
  0xfa   :  { %v209_v17 = vadd.f32 %v804_v16, %v1275_v3  ;;  %v203_v18 = vpop.f32.mrb[5].mxu0  ;;  %1005 = vmatprep.subr.bf16.mxu1 %v976_v51 }
  0xfb   :  { %855 = vmatprep.mubr.f32.mxu1 %v264_v15  ;;  %v204_v19 = vadd.f32 %v1275_v3, %v203_v18 }
  0xfc   :  { %v267_v20 = vmax.f32 %v209_v17, 0.0  ;;  %856 = vmatmul.mubr.f32.gmra.mrb[2].mxu1 %v265_v14 }
  0xfd   :  { %v266_v21 = vmax.f32 %v204_v19, 0.0  ;;  %v807_v22 = vpop.f32.mrb[6].mxu0  ;;  %1013 = vmatpush3.bf16.msra.mxu1 %v976_v51 }
  0xfe   :  { %v219_v23 = vadd.f32 %v807_v22, %v1275_v3  ;;  %v213_v24 = vpop.f32.mrb[7].mxu0  ;;  %1006 = vmatprep.subr.bf16.mxu1 %v980_v54 }
  0xff   :  { %858 = vmatprep.mubr.f32.mxu1 %v266_v21  ;;  %v214_v25 = vadd.f32 %v1275_v3, %v213_v24 }
 0x100   :  { %859 = vmatmul.mubr.f32.gmra.mrb[4].mxu1 %v267_v20  ;;  %v269_v26 = vmax.f32 %v219_v23, 0.0 }
 0x101   :  { %v268_v27 = vmax.f32 %v214_v25, 0.0  ;;  %v810_v28 = vpop.f32.mrb[8].mxu0  ;;  %1014 = vmatpush3.bf16.msra.mxu1 %v980_v54  ;;  %v1000_v54 = vpack.c.bf16 %v477_v53, %v476_v52 }
 0x102   :  { %v229_v29 = vadd.f32 %v810_v28, %v1275_v3  ;;  %v223_v30 = vpop.f32.mrb[9].mxu0  ;;  %1007 = vmatprep.subr.bf16.mxu1 %v1256_v57 }
 0x103   :  { %861 = vmatprep.mubr.f32.mxu1 %v268_v27  ;;  %v224_v31 = vadd.f32 %v1275_v3, %v223_v30  ;;  %1001 = vmatprep.subr.bf16.mxu0 %v1000_v54 }
 0x104   :  { %862 = vmatmul.mubr.f32.gmra.mrb[6].mxu1 %v269_v26  ;;  %v271_v32 = vmax.f32 %v229_v29, 0.0  ;;  %1003 = vmatpush3.bf16.msra.mxu0 %v1000_v54 }
 0x105   :  { %v270_v33 = vmax.f32 %v224_v31, 0.0  ;;  %v813_v34 = vpop.f32.mrb[10].mxu0  ;;  %1015 = vmatpush3.bf16.msra.mxu1 %v1256_v57 }
 0x106   :  { %v239_v35 = vadd.f32 %v813_v34, %v1275_v3  ;;  %v233_v36 = vpop.f32.mrb[11].mxu0  ;;  %1008 = vmatprep.subr.bf16.mxu1 %v1259_v60 }
 0x107   :  { %864 = vmatprep.mubr.f32.mxu1 %v270_v33  ;;  %v234_v37 = vadd.f32 %v1275_v3, %v233_v36 }
 0x108   :  { %865 = vmatmul.mubr.f32.gmra.mrb[8].mxu1 %v271_v32  ;;  %v273_v38 = vmax.f32 %v239_v35, 0.0 }
 0x109   :  { %v272_v39 = vmax.f32 %v234_v37, 0.0  ;;  %v816_v40 = vpop.f32.mrb[12].mxu0  ;;  %1016 = vmatpush3.bf16.msra.mxu1 %v1259_v60 }
 0x10a   :  { %v249_v41 = vadd.f32 %v816_v40, %v1275_v3  ;;  %v243_v42 = vpop.f32.mrb[13].mxu0  ;;  %1009 = vmatprep.subr.bf16.mxu1 %v1263_v63  ;;  %v702_v40 = vld [vmem:[%s1325_s6] ss:$0 sm:$0xff]  ;;  %s1079_s6 = smov [#allocation5]  }
 0x10b   :  { %867 = vmatprep.mubr.f32.mxu1 %v272_v39  ;;  %v244_v43 = vadd.f32 %v1275_v3, %v243_v42  ;;  %s675_s14 = sshll.u32 %s1079_s6, 4  ;;  %s676_s14 = int_to_ptr.vmem [resolvable:$true] %s675_s14 }
 0x10c   :  { %868 = vmatmul.mubr.f32.gmra.mrb[10].mxu1 %v273_v38  ;;  %v275_v44 = vmax.f32 %v249_v41, 0.0  ;;  %s1050_s15 = scalar_lea.vmem %s676_s14, 16  ;;  %s1054_s16 = scalar_lea.vmem %s676_s14, 32 }
 0x10d   :  { %v274_v45 = vmax.f32 %v244_v43, 0.0  ;;  %v819_v46 = vpop.f32.mrb[14].mxu0  ;;  %1017 = vmatpush3.bf16.msra.mxu1 %v1263_v63  ;;  %p1051_p8 = scmp.ne.s32.totalorder %s676_s14, %s1050_s15  ;;  %p1055_p9 = scmp.lt.s32.totalorder %s676_s14, %s676_s14 }
 0x10e   :  { %v259_v47 = vadd.f32 %v819_v46, %v1275_v3  ;;  %v253_v48 = vpop.f32.mrb[15].mxu0  ;;  %1010 = vmatprep.subr.bf16.mxu1 %v1267_v2  ;;  %p1056_p10 = scmp.lt.s32.totalorder %s1054_s16, %s1050_s15 }
 0x10f   :  { %870 = vmatprep.mubr.f32.mxu1 %v274_v45  ;;  %v254_v49 = vadd.f32 %v1275_v3, %v253_v48 }
 0x110   :  { %871 = vmatmul.mubr.f32.gmra.mrb[12].mxu1 %v275_v44  ;;  %v277_v50 = vmax.f32 %v259_v47, 0.0  ;;  %p1057_p11 = por %p1056_p10, %p1055_p9 }
 0x111   :  { %v276_v51 = vmax.f32 %v254_v49, 0.0  ;;  %1018 = vmatpush3.bf16.msra.mxu1 %v1267_v2 }
 0x112   :  { %1011 = vmatprep.subr.bf16.mxu1 %v1000_v54  ;;  %p1058_p12 = pnand %p1057_p11, %p1051_p8 }
 0x113   :  { %873 = vmatprep.mubr.f32.mxu1 %v276_v51 }
 0x114   :  { %874 = vmatmul.mubr.f32.gmra.mrb[14].mxu1 %v277_v50 }
 0x115   :  { %1019 = vmatpush3.bf16.msra.mxu1 %v1000_v54 }
 0x1cb   :  { %v854_v56 = vpop.f32.mrb[0].mxu1 }
 0x1cc   :  { %v373_v57 = vadd.f32 %v854_v56, %v701_v55  ;;  %v367_v58 = vpop.f32.mrb[1].mxu1 }
 0x1cd   :  { %v368_v59 = vadd.f32 %v701_v55, %v367_v58 }
 0x1ce   :  { %v447_v62 = vmax.f32 %v373_v57, 0.0 }
 0x1cf   :  { %v446_v60 = vmax.f32 %v368_v59, 0.0  ;;  %v857_v61 = vpop.f32.mrb[2].mxu1 }
 0x1d0   :  { %v383_v63 = vadd.f32 %v857_v61, %v701_v55  ;;  %v377_v0 = vpop.f32.mrb[3].mxu1 }
 0x1d1   :  { %v378_v1 = vadd.f32 %v701_v55, %v377_v0  ;;  %908 = vmatprep.mubr.f32.mxu0 %v446_v60 }
 0x1d2   :  { %v449_v2 = vmax.f32 %v383_v63, 0.0  ;;  %909 = vmatmul.mubr.f32.vlgmr.msra.gmra.mrb[16].mxu0 %v447_v62 }
 0x1d3   :  { %v448_v3 = vmax.f32 %v378_v1, 0.0  ;;  %v860_v4 = vpop.f32.mrb[4].mxu1 }
 0x1d4   :  { %v393_v5 = vadd.f32 %v860_v4, %v701_v55  ;;  %v387_v6 = vpop.f32.mrb[5].mxu1 }
 0x1d5   :  { %911 = vmatprep.mubr.f32.mxu0 %v448_v3  ;;  %v388_v7 = vadd.f32 %v701_v55, %v387_v6 }
 0x1d6   :  { %v451_v8 = vmax.f32 %v393_v5, 0.0  ;;  %912 = vmatmul.mubr.f32.gmra.mrb[18].mxu0 %v449_v2 }
 0x1d7   :  { %v450_v9 = vmax.f32 %v388_v7, 0.0  ;;  %v863_v10 = vpop.f32.mrb[6].mxu1 }
 0x1d8   :  { %v403_v11 = vadd.f32 %v863_v10, %v701_v55  ;;  %v397_v12 = vpop.f32.mrb[7].mxu1 }
 0x1d9   :  { %914 = vmatprep.mubr.f32.mxu0 %v450_v9  ;;  %v398_v13 = vadd.f32 %v701_v55, %v397_v12 }
 0x1da   :  { %915 = vmatmul.mubr.f32.gmra.mrb[20].mxu0 %v451_v8  ;;  %v453_v14 = vmax.f32 %v403_v11, 0.0 }
 0x1db   :  { %v452_v15 = vmax.f32 %v398_v13, 0.0  ;;  %v866_v16 = vpop.f32.mrb[8].mxu1 }
 0x1dc   :  { %v413_v17 = vadd.f32 %v866_v16, %v701_v55  ;;  %v407_v18 = vpop.f32.mrb[9].mxu1 }
 0x1dd   :  { %917 = vmatprep.mubr.f32.mxu0 %v452_v15  ;;  %v408_v19 = vadd.f32 %v701_v55, %v407_v18 }
 0x1de   :  { %918 = vmatmul.mubr.f32.gmra.mrb[22].mxu0 %v453_v14  ;;  %v455_v20 = vmax.f32 %v413_v17, 0.0 }
 0x1df   :  { %v454_v21 = vmax.f32 %v408_v19, 0.0  ;;  %v869_v22 = vpop.f32.mrb[10].mxu1 }
 0x1e0   :  { %v423_v23 = vadd.f32 %v869_v22, %v701_v55  ;;  %v417_v24 = vpop.f32.mrb[11].mxu1 }
 0x1e1   :  { %920 = vmatprep.mubr.f32.mxu0 %v454_v21  ;;  %v418_v25 = vadd.f32 %v701_v55, %v417_v24 }
 0x1e2   :  { %921 = vmatmul.mubr.f32.gmra.mrb[24].mxu0 %v455_v20  ;;  %v457_v26 = vmax.f32 %v423_v23, 0.0 }
 0x1e3   :  { %v456_v27 = vmax.f32 %v418_v25, 0.0  ;;  %v872_v28 = vpop.f32.mrb[12].mxu1 }
 0x1e4   :  { %v433_v29 = vadd.f32 %v872_v28, %v701_v55  ;;  %v427_v30 = vpop.f32.mrb[13].mxu1 }
 0x1e5   :  { %923 = vmatprep.mubr.f32.mxu0 %v456_v27  ;;  %v428_v31 = vadd.f32 %v701_v55, %v427_v30 }
 0x1e6   :  { %924 = vmatmul.mubr.f32.gmra.mrb[26].mxu0 %v457_v26  ;;  %v459_v32 = vmax.f32 %v433_v29, 0.0 }
 0x1e7   :  { %v458_v33 = vmax.f32 %v428_v31, 0.0  ;;  %v875_v34 = vpop.f32.mrb[14].mxu1 }
 0x1e8   :  { %v443_v35 = vadd.f32 %v875_v34, %v701_v55  ;;  %v437_v36 = vpop.f32.mrb[15].mxu1 }
 0x1e9   :  { %926 = vmatprep.mubr.f32.mxu0 %v458_v33  ;;  %v438_v37 = vadd.f32 %v701_v55, %v437_v36 }
 0x1ea   :  { %927 = vmatmul.mubr.f32.gmra.mrb[28].mxu0 %v459_v32  ;;  %v461_v38 = vmax.f32 %v443_v35, 0.0 }
 0x1eb   :  { %v460_v39 = vmax.f32 %v438_v37, 0.0 }
 0x1ed   :  { %929 = vmatprep.mubr.f32.mxu1 %v460_v39 }
 0x1ee   :  { %930 = vmatmul.mubr.f32.vlgmr.msra.gmra.mrb[16].mxu1 %v461_v38 }
 0x2a5   :  { %v910_v41 = vpop.f32.mrb[16].mxu0 }
 0x2a6   :  { %v551_v42 = vpop.f32.mrb[17].mxu0  ;;  %v557_v46 = vadd.f32 %v910_v41, %v702_v40 }
 0x2a7   :  { %v552_v43 = vadd.f32 %v702_v40, %v551_v42 }
 0x2a9   :  { %v913_v44 = vpop.f32.mrb[18].mxu0  ;;  %630 = vxpose.xlu0.b32.start [1/16] (narrow) %v552_v43, 8 }
 0x2aa   :  { %v561_v45 = vpop.f32.mrb[19].mxu0  ;;  %v567_v52 = vadd.f32 %v913_v44, %v702_v40 }
 0x2ab   :  { %v562_v49 = vadd.f32 %v702_v40, %v561_v45 }
 0x2ad   :  { %631 = vxpose.xlu0.b32.cont [2/16] (narrow) %v557_v46, 8  ;;  %v916_v47 = vpop.f32.mrb[20].mxu0 }
 0x2ae   :  { %v571_v48 = vpop.f32.mrb[21].mxu0  ;;  %v577_v58 = vadd.f32 %v916_v47, %v702_v40 }
 0x2af   :  { %v572_v55 = vadd.f32 %v702_v40, %v571_v48 }
 0x2b1   :  { %632 = vxpose.xlu0.b32.cont [3/16] (narrow) %v562_v49, 8  ;;  %v919_v50 = vpop.f32.mrb[22].mxu0 }
 0x2b2   :  { %v581_v51 = vpop.f32.mrb[23].mxu0  ;;  %v587_v0 = vadd.f32 %v919_v50, %v702_v40 }
 0x2b3   :  { %v582_v61 = vadd.f32 %v702_v40, %v581_v51 }
 0x2b5   :  { %633 = vxpose.xlu0.b32.cont [4/16] (narrow) %v567_v52, 8  ;;  %v922_v53 = vpop.f32.mrb[24].mxu0 }
 0x2b6   :  { %v591_v54 = vpop.f32.mrb[25].mxu0  ;;  %v597_v2 = vadd.f32 %v922_v53, %v702_v40 }
 0x2b7   :  { %v592_v1 = vadd.f32 %v702_v40, %v591_v54 }
 0x2b9   :  { %634 = vxpose.xlu0.b32.cont [5/16] (narrow) %v572_v55, 8  ;;  %v925_v56 = vpop.f32.mrb[26].mxu0 }
 0x2ba   :  { %v601_v57 = vpop.f32.mrb[27].mxu0  ;;  %v607_v4 = vadd.f32 %v925_v56, %v702_v40 }
 0x2bb   :  { %v602_v3 = vadd.f32 %v702_v40, %v601_v57 }
 0x2bd   :  { %635 = vxpose.xlu0.b32.cont [6/16] (narrow) %v577_v58, 8  ;;  %v928_v59 = vpop.f32.mrb[28].mxu0 }
 0x2be   :  { %v611_v60 = vpop.f32.mrb[29].mxu0  ;;  %v617_v6 = vadd.f32 %v928_v59, %v702_v40 }
 0x2bf   :  { %v612_v5 = vadd.f32 %v702_v40, %v611_v60 }
 0x2c1   :  { %636 = vxpose.xlu0.b32.cont [7/16] (narrow) %v582_v61, 8  ;;  %v931_v62 = vpop.f32.mrb[16].mxu1 }
 0x2c2   :  { %v621_v63 = vpop.f32.mrb[17].mxu1  ;;  %v627_v8 = vadd.f32 %v931_v62, %v702_v40 }
 0x2c3   :  { %v622_v7 = vadd.f32 %v702_v40, %v621_v63 }
 0x2c5   :  { %637 = vxpose.xlu0.b32.cont [8/16] (narrow) %v587_v0, 8 }
 0x2c9   :  { %638 = vxpose.xlu0.b32.cont [9/16] (narrow) %v592_v1, 8 }
 0x2cd   :  { %639 = vxpose.xlu0.b32.cont [10/16] (narrow) %v597_v2, 8 }
 0x2d1   :  { %640 = vxpose.xlu0.b32.cont [11/16] (narrow) %v602_v3, 8 }
 0x2d5   :  { %641 = vxpose.xlu0.b32.cont [12/16] (narrow) %v607_v4, 8 }
 0x2d9   :  { %642 = vxpose.xlu0.b32.cont [13/16] (narrow) %v612_v5, 8 }
 0x2dd   :  { %643 = vxpose.xlu0.b32.cont [14/16] (narrow) %v617_v6, 8 }
 0x2e1   :  { %644 = vxpose.xlu0.b32.cont [15/16] (narrow) %v622_v7, 8 }
 0x2e5   :  { %645 = vxpose.xlu0.b32.end [16/16] (narrow) %v627_v8, 8 }
 0x329   :  { %v646_v9 = vpop.trf.xlu0 }
 0x32a   :  { %v703_v10 = vmul.f32 -1.442695, %v646_v9 }
 0x32c   :  { %1024 = vpow2.f32 %v703_v10 }
 0x336   :  { %v1025_v11 = vpop.eup %1024 }
 0x337   :  { %v665_v12 = vadd.f32 1.0, %v1025_v11 }
 0x339   :  { %1026 = vrcp.f32 %v665_v12 }
 0x343   :  { %v1027_v13 = vpop.eup %1026 }
 0x344   :  { %668 = vst [vmem:[#allocation5] sm:$0x1] %v1027_v13 }
 0x345   :  { %1061 = shalt.err (!%p1058_p12)
}
 0x346   :  { %s1062_s19 = scalar_lea.hbm %s1326_s7, 16 }
 0x347   :  { %p1063_p13 = scmp.ne.s32.totalorder %s1326_s7, %s1062_s19  ;;  %p1066_p0 = scmp.lt.u32.totalorder %s1062_s19, %s1326_s7 }
 0x349   :  { %p1068_p1 = pnand %p1066_p0, %p1063_p13 }
 0x34b   :  { %1071 = shalt.err (!%p1068_p1)
}
 0x34c   :  { %678 = dma.vmem_to_hbm [thread:$0]  %s676_s14, 16, %s1326_s7, [#allocation4]  }
 0x34d   :  { %1074 = dma.done.wait [#allocation4], 16  }
 0x34e   :  { %1075 = vsyncadd [#allocation4], 4294967280 }
 0x34f   :  { %682 = vsyncpa [#allocation3], 1 }
 0x350   :  { %683 = vsyncpa [#allocation4], 1 }

</bundles_post_ra>
